<compile_context>
chip_gen: v7x
topology: tpu7x:2x2x1
jax: 0.10.0
libtpu: 0.0.40
codegen_flags: <defaults>
</compile_context>

<pallas_src>
import jax
import jax.numpy as jnp
from jax.experimental import pallas as pl
from jax.experimental.pallas import tpu as pltpu


LANE = 128  # TPU lane width; all padded feature dims are multiples of this.


def _round_up(n, m):
    return ((n + m - 1) // m) * m


def mlp_kernel(x_ref, w1_ref, b1_ref, w2_ref, b2_ref, w3_ref, b3_ref, o_ref):
    # Layer 1: Linear (f32 MXU accumulation) + bias + ReLU in f32.
    h1 = jnp.dot(x_ref[...], w1_ref[...], preferred_element_type=jnp.float32)
    h1 = jnp.maximum(h1 + b1_ref[...], 0.0).astype(w2_ref.dtype)

    # Layer 2: Linear + bias + ReLU.
    h2 = jnp.dot(h1, w2_ref[...], preferred_element_type=jnp.float32)
    h2 = jnp.maximum(h2 + b2_ref[...], 0.0).astype(w3_ref.dtype)

    # Output head: Linear (no activation).
    out = jnp.dot(h2, w3_ref[...], preferred_element_type=jnp.float32) + b3_ref[...]
    o_ref[...] = out.astype(o_ref.dtype)


def mlp_forward(x, w1, b1, w2, b2, w3, b3, *, batch_tile=256):
    """x: (B, inp_dim); w_i: (in, out); b_i: (1, out). Returns (B, num_classes)."""
    B, inp_dim = x.shape
    hid_dim = w1.shape[1]
    num_classes = w3.shape[1]

    # --- pad all dims to lane/MXU-friendly sizes -----------------------------
    inp_p = _round_up(inp_dim, LANE)
    hid_p = _round_up(hid_dim, LANE)
    cls_p = _round_up(num_classes, LANE)

    batch_tile = _round_up(batch_tile, LANE)          # MXU-aligned M tile
    tile_b = min(batch_tile, _round_up(B, LANE))      # don't over-tile tiny batches
    B_p = _round_up(B, tile_b)

    def pad2(a, rows, cols):
        return jnp.pad(a, ((0, rows - a.shape[0]), (0, cols - a.shape[1])))

    f32 = jnp.float32
    x_p = pad2(x, B_p, inp_p)
    w1_p = pad2(w1, inp_p, hid_p)
    w2_p = pad2(w2, hid_p, hid_p)
    w3_p = pad2(w3, hid_p, cls_p)
    # Biases kept in f32 so the bias-add / ReLU path stays native-width VPU work.
    b1_p = pad2(b1.reshape(1, -1).astype(f32), 1, hid_p)
    b2_p = pad2(b2.reshape(1, -1).astype(f32), 1, hid_p)
    b3_p = pad2(b3.reshape(1, -1).astype(f32), 1, cls_p)

    grid = (B_p // tile_b,)

    # Batch-tiled input/output; weights/biases have constant index_maps so they
    # are held resident in VMEM across grid steps.
    in_specs = [
        pl.BlockSpec((tile_b, inp_p), lambda i: (i, 0)),   # x tile
        pl.BlockSpec((inp_p, hid_p), lambda i: (0, 0)),    # w1 (resident)
        pl.BlockSpec((1, hid_p), lambda i: (0, 0)),        # b1
        pl.BlockSpec((hid_p, hid_p), lambda i: (0, 0)),    # w2 (resident)
        pl.BlockSpec((1, hid_p), lambda i: (0, 0)),        # b2
        pl.BlockSpec((hid_p, cls_p), lambda i: (0, 0)),    # w3 (resident)
        pl.BlockSpec((1, cls_p), lambda i: (0, 0)),        # b3
    ]
    # Lane-dense (cls_p multiple of 128) output block -> unmasked full-width stores.
    out_specs = pl.BlockSpec((tile_b, cls_p), lambda i: (i, 0))

    out_p = pl.pallas_call(
        mlp_kernel,
        out_shape=jax.ShapeDtypeStruct((B_p, cls_p), x.dtype),
        grid_spec=pltpu.PrefetchScalarGridSpec(
            num_scalar_prefetch=0,
            grid=grid,
            in_specs=in_specs,
            out_specs=out_specs,
        ),
        compiler_params=pltpu.CompilerParams(
            dimension_semantics=("parallel",),          # megacore sharding on v7x
            vmem_limit_bytes=64 * 1024 * 1024,          # > v5e's 16 MiB default,
        ),                                              # <= v7x's 64 MiB physical
    )(x_p, w1_p, b1_p, w2_p, b2_p, w3_p, b3_p)

    # Slice the zero padding back off.
    return out_p[:B, :num_classes]


def init_params(key, inp_dim, hid_dim, num_classes, dtype=jnp.float32):
    """Deterministic parameter init (uniform, like torch's default Linear init)."""
    ks = jax.random.split(key, 6)

    def linear_init(kw, kb, fan_in, fan_out):
        bound = 1.0 / jnp.sqrt(fan_in)
        w = jax.random.uniform(kw, (fan_in, fan_out), dtype, -bound, bound)
        b = jax.random.uniform(kb, (1, fan_out), dtype, -bound, bound)
        return w, b

    w1, b1 = linear_init(ks[0], ks[1], inp_dim, hid_dim)
    w2, b2 = linear_init(ks[2], ks[3], hid_dim, hid_dim)
    w3, b3 = linear_init(ks[4], ks[5], hid_dim, num_classes)
    return w1, b1, w2, b2, w3, b3


if __name__ == "__main__":
    key = jax.random.PRNGKey(0)
    k_x, k_p = jax.random.split(key)

    # Small shapes consistent with the module's forward; batch sized so the
    # grid has >= 2 parallel steps after tiling (tile_b = 256 -> grid = 2).
    batch, inp_dim, hid_dim, num_classes = 512, 32, 64, 10

    x = jax.random.normal(k_x, (batch, inp_dim), dtype=jnp.float32)
    w1, b1, w2, b2, w3, b3 = init_params(k_p, inp_dim, hid_dim, num_classes)

    out = mlp_forward(x, w1, b1, w2, b2, w3, b3, batch_tile=256)
    out = jax.block_until_ready(out)

    # Reference check in plain JAX (same math as the PyTorch module).
    h1 = jnp.maximum(x @ w1 + b1, 0.0)
    h2 = jnp.maximum(h1 @ w2 + b2, 0.0)
    ref = h2 @ w3 + b3
    assert out.shape == (batch, num_classes)
    assert jnp.allclose(out, ref, atol=1e-4, rtol=1e-4)

    print("KERNEL_OK")
</pallas_src>

<mosaic_0001>
module attributes {stable_mosaic.version = 11 : i64} {
  func.func @mlp_kernel(%arg0: i32, %arg1: memref<256x128xf32, #tpu.memory_space<vmem>>, %arg2: memref<128x128xf32, #tpu.memory_space<vmem>>, %arg3: memref<1x128xf32, #tpu.memory_space<vmem>>, %arg4: memref<128x128xf32, #tpu.memory_space<vmem>>, %arg5: memref<1x128xf32, #tpu.memory_space<vmem>>, %arg6: memref<128x128xf32, #tpu.memory_space<vmem>>, %arg7: memref<1x128xf32, #tpu.memory_space<vmem>>, %arg8: memref<256x128xf32, #tpu.memory_space<vmem>>) attributes {dimension_semantics = [#tpu.dimension_semantics<parallel>], iteration_bounds = array<i64: 2>, scalar_prefetch = 0 : i64, scratch_operands = 0 : i64, tpu.core_type = #tpu.core_type<tc>, window_params = [{transform_indices = @transform_0, window_bounds = array<i64: 256, 128>}, {pipeline_mode = #tpu.pipeline_mode<synchronous>, transform_indices = @transform_1, window_bounds = array<i64: 128, 128>}, {pipeline_mode = #tpu.pipeline_mode<synchronous>, transform_indices = @transform_2, window_bounds = array<i64: 1, 128>}, {pipeline_mode = #tpu.pipeline_mode<synchronous>, transform_indices = @transform_3, window_bounds = array<i64: 128, 128>}, {pipeline_mode = #tpu.pipeline_mode<synchronous>, transform_indices = @transform_4, window_bounds = array<i64: 1, 128>}, {pipeline_mode = #tpu.pipeline_mode<synchronous>, transform_indices = @transform_5, window_bounds = array<i64: 128, 128>}, {pipeline_mode = #tpu.pipeline_mode<synchronous>, transform_indices = @transform_6, window_bounds = array<i64: 1, 128>}, {transform_indices = @transform_7, window_bounds = array<i64: 256, 128>}]} {
    %c0 = arith.constant 0 : index
    %c0_0 = arith.constant 0 : index
    %0 = vector.load %arg1[%c0, %c0_0] : memref<256x128xf32, #tpu.memory_space<vmem>>, vector<256x128xf32>
    %c0_1 = arith.constant 0 : index
    %c0_2 = arith.constant 0 : index
    %1 = vector.load %arg2[%c0_1, %c0_2] : memref<128x128xf32, #tpu.memory_space<vmem>>, vector<128x128xf32>
    %cst = arith.constant dense<0.000000e+00> : vector<256x128xf32>
    %2 = tpu.matmul %0, %1, %cst {dimension_numbers = #tpu.dot_dimension_numbers<[1], [0], [0], [1], [0, 0, 1, 1], [], []>} : vector<256x128xf32>, vector<128x128xf32>, vector<256x128xf32> -> vector<256x128xf32>
    %c0_3 = arith.constant 0 : index
    %c0_4 = arith.constant 0 : index
    %3 = vector.load %arg3[%c0_3, %c0_4] : memref<1x128xf32, #tpu.memory_space<vmem>>, vector<1x128xf32>
    %4 = vector.broadcast %3 : vector<1x128xf32> to vector<256x128xf32>
    %5 = arith.addf %2, %4 : vector<256x128xf32>
    %cst_5 = arith.constant 0.000000e+00 : f32
    %6 = vector.broadcast %cst_5 : f32 to vector<256x128xf32>
    %7 = arith.maximumf %5, %6 : vector<256x128xf32>
    %c0_6 = arith.constant 0 : index
    %c0_7 = arith.constant 0 : index
    %8 = vector.load %arg4[%c0_6, %c0_7] : memref<128x128xf32, #tpu.memory_space<vmem>>, vector<128x128xf32>
    %cst_8 = arith.constant dense<0.000000e+00> : vector<256x128xf32>
    %9 = tpu.matmul %7, %8, %cst_8 {dimension_numbers = #tpu.dot_dimension_numbers<[1], [0], [0], [1], [0, 0, 1, 1], [], []>} : vector<256x128xf32>, vector<128x128xf32>, vector<256x128xf32> -> vector<256x128xf32>
    %c0_9 = arith.constant 0 : index
    %c0_10 = arith.constant 0 : index
    %10 = vector.load %arg5[%c0_9, %c0_10] : memref<1x128xf32, #tpu.memory_space<vmem>>, vector<1x128xf32>
    %11 = vector.broadcast %10 : vector<1x128xf32> to vector<256x128xf32>
    %12 = arith.addf %9, %11 : vector<256x128xf32>
    %cst_11 = arith.constant 0.000000e+00 : f32
    %13 = vector.broadcast %cst_11 : f32 to vector<256x128xf32>
    %14 = arith.maximumf %12, %13 : vector<256x128xf32>
    %c0_12 = arith.constant 0 : index
    %c0_13 = arith.constant 0 : index
    %15 = vector.load %arg6[%c0_12, %c0_13] : memref<128x128xf32, #tpu.memory_space<vmem>>, vector<128x128xf32>
    %cst_14 = arith.constant dense<0.000000e+00> : vector<256x128xf32>
    %16 = tpu.matmul %14, %15, %cst_14 {dimension_numbers = #tpu.dot_dimension_numbers<[1], [0], [0], [1], [0, 0, 1, 1], [], []>} : vector<256x128xf32>, vector<128x128xf32>, vector<256x128xf32> -> vector<256x128xf32>
    %c0_15 = arith.constant 0 : index
    %c0_16 = arith.constant 0 : index
    %17 = vector.load %arg7[%c0_15, %c0_16] : memref<1x128xf32, #tpu.memory_space<vmem>>, vector<1x128xf32>
    %18 = vector.broadcast %17 : vector<1x128xf32> to vector<256x128xf32>
    %19 = arith.addf %16, %18 : vector<256x128xf32>
    %c0_17 = arith.constant 0 : index
    %c0_18 = arith.constant 0 : index
    %20 = vector.load %arg8[%c0_17, %c0_18] : memref<256x128xf32, #tpu.memory_space<vmem>>, vector<256x128xf32>
    tpu.vector_store %arg8[%c0_17, %c0_18], %19 {strides = array<i32>} : memref<256x128xf32, #tpu.memory_space<vmem>>, vector<256x128xf32>,
    return
  }
  func.func @transform_0(%arg0: i32) -> (i32, i32) {
    %c0_i32 = arith.constant 0 : i32
    %c0_i32_0 = arith.constant 0 : i32
    return %arg0, %c0_i32 : i32, i32
  }
  func.func @transform_1(%arg0: i32) -> (i32, i32) {
    %c0_i32 = arith.constant 0 : i32
    %c0_i32_0 = arith.constant 0 : i32
    %c0_i32_1 = arith.constant 0 : i32
    return %c0_i32, %c0_i32_0 : i32, i32
  }
  func.func @transform_2(%arg0: i32) -> (i32, i32) {
    %c0_i32 = arith.constant 0 : i32
    %c0_i32_0 = arith.constant 0 : i32
    %c0_i32_1 = arith.constant 0 : i32
    return %c0_i32, %c0_i32_0 : i32, i32
  }
  func.func @transform_3(%arg0: i32) -> (i32, i32) {
    %c0_i32 = arith.constant 0 : i32
    %c0_i32_0 = arith.constant 0 : i32
    %c0_i32_1 = arith.constant 0 : i32
    return %c0_i32, %c0_i32_0 : i32, i32
  }
  func.func @transform_4(%arg0: i32) -> (i32, i32) {
    %c0_i32 = arith.constant 0 : i32
    %c0_i32_0 = arith.constant 0 : i32
    %c0_i32_1 = arith.constant 0 : i32
    return %c0_i32, %c0_i32_0 : i32, i32
  }
  func.func @transform_5(%arg0: i32) -> (i32, i32) {
    %c0_i32 = arith.constant 0 : i32
    %c0_i32_0 = arith.constant 0 : i32
    %c0_i32_1 = arith.constant 0 : i32
    return %c0_i32, %c0_i32_0 : i32, i32
  }
  func.func @transform_6(%arg0: i32) -> (i32, i32) {
    %c0_i32 = arith.constant 0 : i32
    %c0_i32_0 = arith.constant 0 : i32
    %c0_i32_1 = arith.constant 0 : i32
    return %c0_i32, %c0_i32_0 : i32, i32
  }
  func.func @transform_7(%arg0: i32) -> (i32, i32) {
    %c0_i32 = arith.constant 0 : i32
    %c0_i32_0 = arith.constant 0 : i32
    return %arg0, %c0_i32 : i32, i32
  }
}

</mosaic_0001>

<bundles_post_ra>
// kernel: tpu_custom_call.1
= control target key start
LH: loop header
LB: loop body
LE: loop exit
PB: predicated region body
PF: predicated region fallthrough
CT: control target
= control target key end

     0   :  { %12 = vsyncpa [#allocation3], 0  ;;  %s2903_s0 = inlined_call_operand.hbm [shape: f32[512,128], index: 0, kind: input, shape index: {}]   ;;  %s2904_s1 = inlined_call_operand.hbm [shape: f32[128,128], index: 1, kind: input, shape index: {}]   ;;  %s2905_s2 = inlined_call_operand.hbm [shape: f32[1,128], index: 2, kind: input, shape index: {}]   ;;  %s2906_s3 = inlined_call_operand.hbm [shape: f32[128,128], index: 3, kind: input, shape index: {}]   ;;  %s2907_s4 = inlined_call_operand.hbm [shape: f32[1,128], index: 4, kind: input, shape index: {}]   ;;  %s2908_s5 = inlined_call_operand.hbm [shape: f32[128,128], index: 5, kind: input, shape index: {}]   ;;  %s2909_s6 = inlined_call_operand.hbm [shape: f32[1,128], index: 6, kind: input, shape index: {}]   ;;  %s2910_s7 = inlined_call_operand.hbm [shape: f32[512,128], index: 7, kind: output, shape index: {}]  }
   0x1   :  { %14 = vsyncpa [#allocation3 + $0x1], 0 }
   0x2   :  { %15 = vsyncpa [#allocation6], 0 }
   0x3   :  { %16 = vsyncpa [#allocation9], 0 }
   0x4   :  { %17 = vsyncpa [#allocation12], 0 }
   0x5   :  { %18 = vsyncpa [#allocation4], 0 }
   0x6   :  { %20 = vsyncpa [#allocation4 + $0x1], 0  ;;  %s2364_s24 = smov 0   ;;  %s2366_s25 = smov 0  }
   0x7   :  { %s2368_s26 = smov 0   ;;  %s2370_s27 = smov 0  }
   0x8 LB: > { %s2312_s28 = smov [#allocation5]   ;;  %s2385_s30 = sadd.s32 4294967295, %s2310_s27   ;;  %s2310_s27 = sphi %s2370_s27, %s2938_s27   ;;  %s2306_s26 = sphi %s2368_s26, %s2937_s26   ;;  %s2302_s25 = sphi %s2366_s25, %s2936_s25   ;;  %s2298_s24 = sphi %s2364_s24, %s2935_s24  }
   0x9   : > { %s221_s29 = sshll.u32 %s2312_s28, 4  ;;  %p1397_p0 = scmp.ge.s32.totalorder %s2310_s27, 1  ;;  %s2390_s29 = int_to_ptr.vmem [resolvable:$true] %s221_s29 }
   0xa   : > { %p2911_p1 = scmp.eq.s32.totalorder %s2385_s30, 0  ;;  %p209_p2 = scmp.lt.s32.totalorder %s2310_s27, 3 }
   0xb   : > { %s2313_s9 = smov [#allocation8]   ;;  %s2314_s12 = smov [#allocation11]  }
   0xc   : > { %p2392_p3 = pnand %p1397_p0, %p209_p2  ;;  %s245_s10 = sshll.u32 %s2313_s9, 4  ;;  %s2405_s10 = int_to_ptr.vmem [resolvable:$true] %s245_s10 }
   0xd   : > { %s269_s13 = sshll.u32 %s2314_s12, 4  ;;  %s2034_s16 = scalar_lea.hbm %s2904_s1, 2048  ;;  %s2407_s13 = int_to_ptr.vmem [resolvable:$true] %s269_s13 }
   0xe   : > { %s2915_s8 = scalar_select %p2392_p3, 1, 0 }
   0xf   : > { %p1951_p5 = pneg %p2392_p3  ;;  %p2035_p7 = scmp.ne.s32.totalorder %s2904_s1, %s2034_s16 }
  0x10   : > { %p2041_p11 = scmp.lt.u32.totalorder %s2034_s16, %s2904_s1 }
  0x11   : > { %p2401_p6 = pnand %p1951_p5, %p2911_p1 }
  0x13   : > { %p2417_p8 = pneg %p2401_p6 }
  0x15   : > { %p2037_p9 = pnand %p2417_p8, %p2035_p7 }
  0x17   : > { %p2038_p10 = pneg %p2037_p9 }
  0x19   : > { %p2043_p12 = pnand %p2041_p11, %p2038_p10 }
  0x1b   : > { %2046 = shalt.err (!%p2043_p12)
}
  0x1c   : > { %s2047_s22 = scalar_lea.vmem %s2390_s29, 2048  ;;  %p2055_p5 = scmp.lt.s32.totalorder %s2390_s29, %s2390_s29 }
  0x1d   : > { %p2048_p13 = scmp.ne.s32.totalorder %s2390_s29, %s2047_s22  ;;  %p2056_p4 = scmp.lt.s32.totalorder %s2047_s22, %s2047_s22 }
  0x1f   : > { %p2050_p0 = pnand %p2048_p13, %p2417_p8  ;;  %p2057_p7 = por %p2056_p4, %p2055_p5 }
  0x21   : > { %p2051_p2 = pneg %p2050_p0 }
  0x23   : > { %p2058_p9 = pnand %p2057_p7, %p2051_p2 }
  0x25   : > { %2061 = shalt.err (!%p2058_p9)
}
  0x26   : > { %s2913_s23 = smov 128   ;;  %s2316_s28 = smov 8  }
  0x27   : > { %1954 = dma.hbm_to_vmem [thread:$0]  (!%p2401_p6), %s2904_s1, 2048, %s2390_s29, [#allocation6], %s2913_s23, %s2913_s23, %s2316_s28  }
  0x28   : > { %s2062_s16 = scalar_lea.hbm %s2906_s3, 2048 }
  0x29   : > { %p2063_p4 = scmp.ne.s32.totalorder %s2906_s3, %s2062_s16  ;;  %p2069_p12 = scmp.lt.u32.totalorder %s2062_s16, %s2906_s3 }
  0x2b   : > { %p2065_p10 = pnand %p2063_p4, %p2417_p8 }
  0x2d   : > { %p2066_p11 = pneg %p2065_p10 }
  0x2f   : > { %p2071_p13 = pnand %p2069_p12, %p2066_p11 }
  0x31   : > { %2074 = shalt.err (!%p2071_p13)
}
  0x32   : > { %s2075_s29 = scalar_lea.vmem %s2405_s10, 2048  ;;  %p2083_p7 = scmp.lt.s32.totalorder %s2405_s10, %s2405_s10 }
  0x33   : > { %p2076_p0 = scmp.ne.s32.totalorder %s2405_s10, %s2075_s29  ;;  %p2084_p9 = scmp.lt.s32.totalorder %s2075_s29, %s2075_s29 }
  0x35   : > { %p2078_p2 = pnand %p2076_p0, %p2417_p8  ;;  %p2085_p4 = por %p2084_p9, %p2083_p7 }
  0x37   : > { %p2079_p5 = pneg %p2078_p2 }
  0x39   : > { %p2086_p10 = pnand %p2085_p4, %p2079_p5 }
  0x3b   : > { %2089 = shalt.err (!%p2086_p10)
}
  0x3c   : > { %1960 = dma.hbm_to_vmem [thread:$0]  (!%p2401_p6), %s2906_s3, 2048, %s2405_s10, [#allocation9], %s2913_s23, %s2913_s23, %s2316_s28  }
  0x3d   : > { %s2090_s15 = scalar_lea.hbm %s2908_s5, 2048 }
  0x3e   : > { %p2091_p11 = scmp.ne.s32.totalorder %s2908_s5, %s2090_s15  ;;  %p2097_p0 = scmp.lt.u32.totalorder %s2090_s15, %s2908_s5 }
  0x40   : > { %p2093_p12 = pnand %p2091_p11, %p2417_p8 }
  0x42   : > { %p2094_p13 = pneg %p2093_p12 }
  0x44   : > { %p2099_p2 = pnand %p2097_p0, %p2094_p13 }
  0x46   : > { %2102 = shalt.err (!%p2099_p2)
}
  0x47   : > { %s2103_s10 = scalar_lea.vmem %s2407_s13, 2048  ;;  %p2111_p4 = scmp.lt.s32.totalorder %s2407_s13, %s2407_s13 }
  0x48   : > { %p2104_p5 = scmp.ne.s32.totalorder %s2407_s13, %s2103_s10  ;;  %p2112_p10 = scmp.lt.s32.totalorder %s2103_s10, %s2103_s10 }
  0x4a   : > { %p2106_p7 = pnand %p2104_p5, %p2417_p8  ;;  %p2113_p11 = por %p2112_p10, %p2111_p4 }
  0x4c   : > { %p2107_p9 = pneg %p2106_p7 }
  0x4e   : > { %p2114_p12 = pnand %p2113_p11, %p2107_p9 }
  0x50   : > { %2117 = shalt.err (!%p2114_p12)
}
  0x51   : > { %1966 = dma.hbm_to_vmem [thread:$0]  (!%p2401_p6), %s2908_s5, 2048, %s2407_s13, [#allocation12], %s2913_s23, %s2913_s23, %s2316_s28  }
  0x52   : > { %s2317_s22 = smov [#allocation7]   ;;  %s2318_s12 = smov [#allocation10]  }
  0x53   : > { %s235_s9 = sshll.u32 %s2317_s22, 4  ;;  %s259_s14 = sshll.u32 %s2318_s12, 4  ;;  %s236_s9 = int_to_ptr.vmem [resolvable:$true] %s235_s9  ;;  %s260_s14 = int_to_ptr.vmem [resolvable:$true] %s259_s14 }
  0x54   : > { %s2118_s17 = scalar_lea.hbm %s2905_s2, 16 }
  0x55   : > { %p2119_p13 = scmp.ne.s32.totalorder %s2905_s2, %s2118_s17  ;;  %p2125_p5 = scmp.lt.u32.totalorder %s2118_s17, %s2905_s2 }
  0x57   : > { %p2121_p0 = pnand %p2119_p13, %p2417_p8 }
  0x59   : > { %p2122_p2 = pneg %p2121_p0 }
  0x5b   : > { %p2127_p7 = pnand %p2125_p5, %p2122_p2 }
  0x5d   : > { %2130 = shalt.err (!%p2127_p7)
}
  0x5e   : > { %s2131_s13 = scalar_lea.vmem %s236_s9, 16  ;;  %s2138_s29 = scalar_lea.vmem %s236_s9, 32 }
  0x5f   : > { %p2132_p9 = scmp.ne.s32.totalorder %s236_s9, %s2131_s13  ;;  %p2139_p11 = scmp.lt.s32.totalorder %s236_s9, %s236_s9 }
  0x60   : > { %p2140_p12 = scmp.lt.s32.totalorder %s2138_s29, %s2131_s13 }
  0x61   : > { %p2134_p4 = pnand %p2132_p9, %p2417_p8 }
  0x62   : > { %p2141_p1 = por %p2140_p12, %p2139_p11 }
  0x63   : > { %p2135_p10 = pneg %p2134_p4 }
  0x65   : > { %p2142_p3 = pnand %p2141_p1, %p2135_p10 }
  0x67   : > { %2145 = shalt.err (!%p2142_p3)
}
  0x68   : > { %1957 = dma.hbm_to_vmem [thread:$0]  (!%p2401_p6), %s2905_s2, 16, %s236_s9, [#allocation6]  }
  0x69   : > { %s2146_s17 = scalar_lea.hbm %s2907_s4, 16 }
  0x6a   : > { %p2147_p13 = scmp.ne.s32.totalorder %s2907_s4, %s2146_s17  ;;  %p2153_p3 = scmp.lt.u32.totalorder %s2146_s17, %s2907_s4 }
  0x6c   : > { %p2149_p0 = pnand %p2147_p13, %p2417_p8 }
  0x6e   : > { %p2150_p1 = pneg %p2149_p0 }
  0x70   : > { %p2155_p2 = pnand %p2153_p3, %p2150_p1 }
  0x72   : > { %2158 = shalt.err (!%p2155_p2)
}
  0x73   : > { %s2159_s13 = scalar_lea.vmem %s260_s14, 16  ;;  %s2166_s9 = scalar_lea.vmem %s260_s14, 32 }
  0x74   : > { %p2160_p5 = scmp.ne.s32.totalorder %s260_s14, %s2159_s13  ;;  %p2167_p4 = scmp.lt.s32.totalorder %s260_s14, %s260_s14 }
  0x75   : > { %p2168_p10 = scmp.lt.s32.totalorder %s2166_s9, %s2159_s13 }
  0x76   : > { %p2162_p7 = pnand %p2160_p5, %p2417_p8 }
  0x77   : > { %p2169_p11 = por %p2168_p10, %p2167_p4 }
  0x78   : > { %p2163_p9 = pneg %p2162_p7 }
  0x7a   : > { %p2170_p12 = pnand %p2169_p11, %p2163_p9 }
  0x7c   : > { %2173 = shalt.err (!%p2170_p12)
}
  0x7d   : > { %1963 = dma.hbm_to_vmem [thread:$0]  (!%p2401_p6), %s2907_s4, 16, %s260_s14, [#allocation9]  }
  0x7e   : > { %s2319_s12 = smov [#allocation13]   ;;  %s2174_s18 = scalar_lea.hbm %s2909_s6, 16 }
  0x7f   : > { %s283_s15 = sshll.u32 %s2319_s12, 4  ;;  %p2175_p13 = scmp.ne.s32.totalorder %s2909_s6, %s2174_s18  ;;  %s284_s15 = int_to_ptr.vmem [resolvable:$true] %s283_s15 }
  0x80   : > { %p2181_p3 = scmp.lt.u32.totalorder %s2174_s18, %s2909_s6 }
  0x81   : > { %p2177_p0 = pnand %p2175_p13, %p2417_p8 }
  0x83   : > { %p2178_p1 = pneg %p2177_p0 }
  0x85   : > { %p2183_p2 = pnand %p2181_p3, %p2178_p1 }
  0x87   : > { %2186 = shalt.err (!%p2183_p2)
}
  0x88   : > { %s2187_s14 = scalar_lea.vmem %s284_s15, 16  ;;  %s2194_s9 = scalar_lea.vmem %s284_s15, 32 }
  0x89   : > { %p2188_p5 = scmp.ne.s32.totalorder %s284_s15, %s2187_s14  ;;  %p2195_p4 = scmp.lt.s32.totalorder %s284_s15, %s284_s15 }
  0x8a   : > { %p2196_p10 = scmp.lt.s32.totalorder %s2194_s9, %s2187_s14 }
  0x8b   : > { %p2190_p7 = pnand %p2188_p5, %p2417_p8 }
  0x8c   : > { %p2197_p11 = por %p2196_p10, %p2195_p4 }
  0x8d   : > { %p2191_p9 = pneg %p2190_p7 }
  0x8f   : > { %p2198_p12 = pnand %p2197_p11, %p2191_p9 }
  0x91   : > { %2201 = shalt.err (!%p2198_p12)
}
  0x92   : > { %1969 = dma.hbm_to_vmem [thread:$0]  (!%p2401_p6), %s2909_s6, 16, %s284_s15, [#allocation12]  }
  0x93   : > { %s1396_s19 = sadd.s32 4294967294, %s2310_s27   ;;  %s2549_s11 = sadd.s32 1, %s2310_s27  }
  0x94   : > { %s30_s12 = ssub.s32 %s2310_s27, %s2549_s11  ;;  %s33_s16 = sadd.s32 1, %s2306_s26 }
  0x95   : > { %p31_p8 = scmp.eq.s32.totalorder %s30_s12, 0  ;;  %p40_p13 = scmp.ne.s32.totalorder %s2306_s26, %s2302_s25 }
  0x96   : > { %p41_p0 = scmp.eq.s32.totalorder %s2310_s27, 0  ;;  %p46_p1 = scmp.ne.s32.totalorder %s2302_s25, %s2298_s24 }
  0x97   : > { %s2560_s17 = scalar_select %p31_p8, %s2306_s26, %s33_s16  }
  0x98   : > { %p2562_p3 = por %p41_p0, %p40_p13  ;;  %p2919_p2 = scmp.eq.s32.totalorder %s2385_s30, 0 }
  0x99   : > { %p196_p5 = scmp.eq.s32.totalorder %s2385_s30, 1  ;;  %p202_p7 = scmp.eq.s32.totalorder %s1396_s19, 1 }
  0x9a   : > { %p2568_p6 = por %p2919_p2, %p46_p1  ;;  %p1984_p9 = scmp.lt.s32.totalorder %s2310_s27, 2 }
  0x9b   : > { %s294_s20 = sand.u32 1, %s2306_s26   ;;  %p2575_p4 = por %p196_p5, %p40_p13 }
  0x9c   : > { %p2579_p10 = por %p202_p7, %p46_p1  ;;  %s1405_s13 = sshll.u32 %s294_s20, 8 }
  0x9d   : > { %s2921_s10 = scalar_select %p2575_p4, 1, 0 }
  0x9e   : > { %s2922_s21 = scalar_select %p2579_p10, 1, 0 }
  0x9f   : > { %s1425_s14 = sshll.u32 %s2310_s27, 12  ;;  %s298_s19 = scalar_lea.vmem [#allocation2], %s1405_s13 }
  0xa0   : > { %s2587_s22 = scalar_lea.hbm %s2903_s0, %s1425_s14  ;;  %s305_s12 = sshll.u32 %s298_s19, 4  ;;  %s2589_s12 = int_to_ptr.vmem [resolvable:$true] %s305_s12 }
  0xa1   : > { %p2593_p11 = pnand %p1984_p9, %p2562_p3  ;;  %s2597_s23 = scalar_lea.sflag [#allocation3], %s294_s20 }
  0xa2   : > { %s2202_s9 = scalar_lea.hbm %s2587_s22, 4096  ;;  %s2207_s18 = scalar_lea.hbm %s2903_s0, 8192 }
  0xa3   : > { %p2203_p12 = scmp.ne.s32.totalorder %s2587_s22, %s2202_s9  ;;  %p2204_p8 = pneg %p2593_p11 }
  0xa4   : > { %p2208_p1 = scmp.lt.u32.totalorder %s2587_s22, %s2903_s0  ;;  %p2209_p3 = scmp.lt.u32.totalorder %s2207_s18, %s2202_s9 }
  0xa5   : > { %p2205_p13 = pnand %p2204_p8, %p2203_p12  ;;  %p2211_p5 = scmp.lt.u32.totalorder %s2202_s9, %s2587_s22 }
  0xa6   : > { %p2210_p2 = por %p2209_p3, %p2208_p1 }
  0xa7   : > { %p2206_p0 = pneg %p2205_p13 }
  0xa8   : > { %p2212_p7 = por %p2211_p5, %p2210_p2 }
  0xaa   : > { %p2213_p9 = pnand %p2212_p7, %p2206_p0 }
  0xac   : > { %2216 = shalt.err (!%p2213_p9)
}
  0xad   : > { %s2217_s20 = scalar_lea.vmem %s2589_s12, 4096  ;;  %s2320_s13 = smov [#allocation2]  }
  0xae   : > { %p2218_p12 = scmp.ne.s32.totalorder %s2589_s12, %s2217_s20  ;;  %s2222_s14 = sshll.u32 %s2320_s13, 4  ;;  %s2223_s14 = int_to_ptr.vmem [resolvable:$false] %s2222_s14 }
  0xaf   : > { %s2224_s29 = scalar_lea.vmem %s2223_s14, 8192  ;;  %p2225_p4 = scmp.lt.s32.totalorder %s2589_s12, %s2223_s14 }
  0xb0   : > { %p2220_p13 = pnand %p2218_p12, %p2204_p8  ;;  %p2226_p1 = scmp.lt.s32.totalorder %s2224_s29, %s2217_s20 }
  0xb2   : > { %p2221_p10 = pneg %p2220_p13  ;;  %p2227_p3 = por %p2226_p1, %p2225_p4 }
  0xb4   : > { %p2228_p2 = pnand %p2227_p3, %p2221_p10 }
  0xb6   : > { %2231 = shalt.err (!%p2228_p2)
}
  0xb7   : > { %s2924_s9 = smov 128   ;;  %p2925_p8 = scmp.ne.s32.totalorder %s2915_s8, 0 }
  0xb8   : > { %1973 = dma.hbm_to_vmem [thread:$0]  (!%p2593_p11), %s2587_s22, 4096, %s2589_s12, %s2597_s23, %s2924_s9, %s2924_s9, %s2316_s28  }
  0xb9   : > { %317 = sbr.rel (%p2925_p8) target bundleno = 964 (0x3c4), region = 48  ;;  %s2631_s18 = sand.u32 (!%p2925_p8), 1, %s2302_s25  }
  0xba   : > { %s1409_s19 = sshll.u32 (!%p2925_p8), %s2631_s18, 8  ;;  %s320_s20 = scalar_lea.sflag (!%p2925_p8), [#allocation3], %s2631_s18 }
  0xbb   : > { %s2637_s16 = scalar_lea.vmem (!%p2925_p8), [#allocation2], %s1409_s19 }
  0xc0   : > { %2277 = dma.done.wait (%p2568_p6), %s320_s20, 4096  }
  0xc1   : > { %2279 = vsyncadd (%p2568_p6), %s320_s20, 4294963200  ;;  %p2926_p4 = scmp.eq.s32.totalorder %s2385_s30, 0 }
  0xc3   : > { %2281 = dma.done.wait (%p2926_p4), [#allocation6], 2064   ;;  %p2927_p10 = pmov %p2926_p4 }
  0xc4   : > { %p2928_p11 = pmov %p2926_p4 }
  0xc5   : > { %2283 = vsyncadd (%p2927_p10), [#allocation6], 4294965232 }
  0xc6   : > { %2285 = dma.done.wait (%p2928_p11), [#allocation9], 2064   ;;  %p2929_p0 = pmov %p2926_p4 }
  0xc8   : > { %2287 = vsyncadd (%p2929_p0), [#allocation9], 4294965232  ;;  %p2930_p5 = pmov %p2929_p0 }
  0xc9   : > { %p2931_p7 = pmov %p2929_p0 }
  0xca   : > { %2289 = dma.done.wait (%p2930_p5), [#allocation12], 2064  }
  0xcb   : > { %2291 = vsyncadd (%p2931_p7), [#allocation12], 4294965232  ;;  %v412_v0 = vld [vmem:[#allocation5] sm:$0xff]  ;;  %v413_v1 = vld [vmem:[#allocation5 + $0x8] sm:$0xff]  ;;  %s2788_s8 = scalar_lea.vmem [#allocation14], %s1409_s19  ;;  %s1426_s23 = sshll.u32 %s2385_s30, 12 }
  0xcc   : > { %v414_v2 = vld [vmem:[#allocation5 + $0x10] sm:$0xff]  ;;  %v1811_v3 = vpack.c.bf16 %v413_v1, %v412_v0  ;;  %v415_v4 = vld [vmem:[#allocation5 + $0x18] sm:$0xff]  ;;  %v416_v6 = vld [vmem:[#allocation5 + $0x20] sm:$0xff]  ;;  %s1266_s28 = sshll.u32 %s2788_s8, 4  ;;  %s2854_s12 = scalar_lea.hbm %s2910_s7, %s1426_s23  ;;  %s2856_s28 = int_to_ptr.vmem [resolvable:$true] %s1266_s28 }
  0xcd   : > { %v1815_v5 = vpack.c.bf16 %v415_v4, %v414_v2  ;;  %v417_v7 = vld [vmem:[#allocation5 + $0x28] sm:$0xff]  ;;  %v380_v9 = vld [vmem:[%s2637_s16] sm:$0xff]  ;;  %v418_v10 = vld [vmem:[#allocation5 + $0x30] sm:$0xff]  ;;  %s1253_s30 = scalar_lea.sflag [#allocation4], %s2631_s18  ;;  %s2232_s13 = scalar_lea.vmem %s2856_s28, 4096 }
  0xce   : > { %1812 = vmatprep.subr.bf16.mxu0 %v1811_v3  ;;  %1907 = vmatprep.subr.bf16.mxu1 %v1811_v3  ;;  %v1819_v8 = vpack.c.bf16 %v417_v7, %v416_v6  ;;  %v419_v11 = vld [vmem:[#allocation5 + $0x38] sm:$0xff]  ;;  %v420_v13 = vld [vmem:[#allocation5 + $0x40] sm:$0xff]  ;;  %v421_v14 = vld [vmem:[#allocation5 + $0x48] sm:$0xff]  ;;  %p2233_p6 = scmp.ne.s32.totalorder %s2856_s28, %s2232_s13  ;;  %p2932_p9 = scmp.ne.s32.totalorder %s2921_s10, 0 }
  0xcf   : > { %1814 = vmatpush3.bf16.msra.mxu0 %v1811_v3  ;;  %1915 = vmatpush3.bf16.msra.mxu1 %v1811_v3  ;;  %v1823_v12 = vpack.c.bf16 %v419_v11, %v418_v10  ;;  %v396_v15 = vld [vmem:[%s2637_s16 + $0x80] sm:$0xff]  ;;  %v1827_v16 = vpack.c.bf16 %v421_v14, %v420_v13  ;;  %v422_v17 = vld [vmem:[#allocation5 + $0x50] sm:$0xff]  ;;  %v423_v18 = vld [vmem:[#allocation5 + $0x58] sm:$0xff]  ;;  %s2321_s14 = smov [#allocation14]  }
  0xd0   : > { %1816 = vmatprep.subr.bf16.mxu0 %v1815_v5  ;;  %1908 = vmatprep.subr.bf16.mxu1 %v1815_v5  ;;  %v1831_v19 = vpack.c.bf16 %v423_v18, %v422_v17  ;;  %v424_v20 = vld [vmem:[#allocation5 + $0x60] sm:$0xff]  ;;  %v425_v21 = vld [vmem:[#allocation5 + $0x68] sm:$0xff]  ;;  %v426_v23 = vld [vmem:[#allocation5 + $0x70] sm:$0xff]  ;;  %p2234_p12 = pnand %p2233_p6, %p2932_p9  ;;  %s2236_s29 = sshll.u32 %s2321_s14, 4  ;;  %s2237_s29 = int_to_ptr.vmem [resolvable:$false] %s2236_s29 }
  0xd1   : > { %1603 = vmatprep.mubr.f32.mxu0 %v380_v9  ;;  %1627 = vmatprep.mubr.f32.mxu1 %v396_v15  ;;  %v1835_v22 = vpack.c.bf16 %v425_v21, %v424_v20  ;;  %v427_v24 = vld [vmem:[#allocation5 + $0x78] sm:$0xff]  ;;  %v692_v26 = vld [vmem:[#allocation8] sm:$0xff]  ;;  %v693_v27 = vld [vmem:[#allocation8 + $0x8] sm:$0xff]  ;;  %s2238_s9 = scalar_lea.vmem %s2237_s29, 8192  ;;  %p2239_p1 = scmp.lt.s32.totalorder %s2856_s28, %s2237_s29 }
  0xd2   : > { %v1839_v25 = vpack.c.bf16 %v427_v24, %v426_v23  ;;  %v1843_v28 = vpack.c.bf16 %v693_v27, %v692_v26  ;;  %v694_v29 = vld [vmem:[#allocation8 + $0x10] sm:$0xff]  ;;  %v695_v30 = vld [vmem:[#allocation8 + $0x18] sm:$0xff]  ;;  %v381_v31 = vld [vmem:[%s2637_s16 + $0x8] sm:$0xff]  ;;  %p2235_p13 = pneg %p2234_p12  ;;  %p2240_p3 = scmp.lt.s32.totalorder %s2238_s9, %s2232_s13 }
  0xd3   : > { %1818 = vmatpush3.bf16.msra.mxu0 %v1815_v5  ;;  %1916 = vmatpush3.bf16.msra.mxu1 %v1815_v5  ;;  %v397_v32 = vld [vmem:[%s2637_s16 + $0x88] sm:$0xff]  ;;  %v382_v33 = vld [vmem:[%s2637_s16 + $0x10] sm:$0xff]  ;;  %v1847_v35 = vpack.c.bf16 %v695_v30, %v694_v29  ;;  %v383_v38 = vld [vmem:[%s2637_s16 + $0x18] sm:$0xff] }
  0xd4   : > { %1820 = vmatprep.subr.bf16.mxu0 %v1819_v8  ;;  %1909 = vmatprep.subr.bf16.mxu1 %v1819_v8  ;;  %v398_v34 = vld [vmem:[%s2637_s16 + $0x90] sm:$0xff]  ;;  %v696_v36 = vld [vmem:[#allocation8 + $0x20] sm:$0xff]  ;;  %v399_v39 = vld [vmem:[%s2637_s16 + $0x98] sm:$0xff]  ;;  %p2241_p2 = por %p2240_p3, %p2239_p1 }
  0xd5   : > { %v697_v37 = vld [vmem:[#allocation8 + $0x28] sm:$0xff]  ;;  %v384_v40 = vld [vmem:[%s2637_s16 + $0x20] sm:$0xff]  ;;  %v698_v43 = vld [vmem:[#allocation8 + $0x30] sm:$0xff] }
  0xd6   : > { %v400_v41 = vld [vmem:[%s2637_s16 + $0xa0] sm:$0xff]  ;;  %v1851_v42 = vpack.c.bf16 %v697_v37, %v696_v36  ;;  %v385_v45 = vld [vmem:[%s2637_s16 + $0x28] sm:$0xff]  ;;  %v386_v47 = vld [vmem:[%s2637_s16 + $0x30] sm:$0xff]  ;;  %p2242_p8 = pnand %p2241_p2, %p2235_p13 }
  0xd7   : > { %1822 = vmatpush3.bf16.msra.mxu0 %v1819_v8  ;;  %1917 = vmatpush3.bf16.msra.mxu1 %v1819_v8  ;;  %v699_v44 = vld [vmem:[#allocation8 + $0x38] sm:$0xff]  ;;  %v401_v46 = vld [vmem:[%s2637_s16 + $0xa8] sm:$0xff]  ;;  %v402_v48 = vld [vmem:[%s2637_s16 + $0xb0] sm:$0xff] }
  0xd8   : > { %1824 = vmatprep.subr.bf16.mxu0 %v1823_v12  ;;  %1910 = vmatprep.subr.bf16.mxu1 %v1823_v12  ;;  %v1855_v49 = vpack.c.bf16 %v699_v44, %v698_v43  ;;  %v700_v50 = vld [vmem:[#allocation8 + $0x40] sm:$0xff]  ;;  %v701_v51 = vld [vmem:[#allocation8 + $0x48] sm:$0xff]  ;;  %v387_v52 = vld [vmem:[%s2637_s16 + $0x38] sm:$0xff] }
  0xd9   : > { %v403_v53 = vld [vmem:[%s2637_s16 + $0xb8] sm:$0xff]  ;;  %v388_v54 = vld [vmem:[%s2637_s16 + $0x40] sm:$0xff]  ;;  %v1859_v56 = vpack.c.bf16 %v701_v51, %v700_v50  ;;  %v389_v59 = vld [vmem:[%s2637_s16 + $0x48] sm:$0xff] }
  0xda   : > { %v404_v55 = vld [vmem:[%s2637_s16 + $0xc0] sm:$0xff]  ;;  %v702_v57 = vld [vmem:[#allocation8 + $0x50] sm:$0xff]  ;;  %v405_v60 = vld [vmem:[%s2637_s16 + $0xc8] sm:$0xff] }
  0xdb   : > { %1826 = vmatpush3.bf16.msra.mxu0 %v1823_v12  ;;  %1918 = vmatpush3.bf16.msra.mxu1 %v1823_v12  ;;  %v703_v58 = vld [vmem:[#allocation8 + $0x58] sm:$0xff]  ;;  %v390_v61 = vld [vmem:[%s2637_s16 + $0x50] sm:$0xff]  ;;  %v704_v0 = vld [vmem:[#allocation8 + $0x60] sm:$0xff] }
  0xdc   : > { %1828 = vmatprep.subr.bf16.mxu0 %v1827_v16  ;;  %1911 = vmatprep.subr.bf16.mxu1 %v1827_v16  ;;  %v406_v62 = vld [vmem:[%s2637_s16 + $0xd0] sm:$0xff]  ;;  %v1863_v63 = vpack.c.bf16 %v703_v58, %v702_v57  ;;  %v391_v2 = vld [vmem:[%s2637_s16 + $0x58] sm:$0xff]  ;;  %v392_v4 = vld [vmem:[%s2637_s16 + $0x60] sm:$0xff] }
  0xdd   : > { %v705_v1 = vld [vmem:[#allocation8 + $0x68] sm:$0xff]  ;;  %v407_v3 = vld [vmem:[%s2637_s16 + $0xd8] sm:$0xff]  ;;  %v408_v5 = vld [vmem:[%s2637_s16 + $0xe0] sm:$0xff] }
  0xde   : > { %v1867_v6 = vpack.c.bf16 %v705_v1, %v704_v0  ;;  %v393_v7 = vld [vmem:[%s2637_s16 + $0x68] sm:$0xff]  ;;  %v394_v9 = vld [vmem:[%s2637_s16 + $0x70] sm:$0xff]  ;;  %v395_v11 = vld [vmem:[%s2637_s16 + $0x78] sm:$0xff] }
  0xdf   : > { %1830 = vmatpush3.bf16.msra.mxu0 %v1827_v16  ;;  %1919 = vmatpush3.bf16.msra.mxu1 %v1827_v16  ;;  %v409_v8 = vld [vmem:[%s2637_s16 + $0xe8] sm:$0xff]  ;;  %v410_v10 = vld [vmem:[%s2637_s16 + $0xf0] sm:$0xff]  ;;  %v411_v12 = vld [vmem:[%s2637_s16 + $0xf8] sm:$0xff] }
  0xe0   : > { %1832 = vmatprep.subr.bf16.mxu0 %v1831_v19  ;;  %1912 = vmatprep.subr.bf16.mxu1 %v1831_v19  ;;  %v706_v13 = vld [vmem:[#allocation8 + $0x70] sm:$0xff]  ;;  %v707_v14 = vld [vmem:[#allocation8 + $0x78] sm:$0xff]  ;;  %v972_v16 = vld [vmem:[#allocation11] sm:$0xff] }
  0xe1   : > { %v1871_v15 = vpack.c.bf16 %v707_v14, %v706_v13  ;;  %v973_v17 = vld [vmem:[#allocation11 + $0x8] sm:$0xff]  ;;  %v974_v18 = vld [vmem:[#allocation11 + $0x10] sm:$0xff]  ;;  %v975_v20 = vld [vmem:[#allocation11 + $0x18] sm:$0xff] }
  0xe2   : > { %v1879_v21 = vpack.c.bf16 %v975_v20, %v974_v18  ;;  %v977_v23 = vld [vmem:[#allocation11 + $0x28] sm:$0xff]  ;;  %v979_v26 = vld [vmem:[#allocation11 + $0x38] sm:$0xff] }
  0xe3   : > { %1834 = vmatpush3.bf16.msra.mxu0 %v1831_v19  ;;  %1920 = vmatpush3.bf16.msra.mxu1 %v1831_v19  ;;  %v1875_v19 = vpack.c.bf16 %v973_v17, %v972_v16  ;;  %v981_v29 = vld [vmem:[#allocation11 + $0x48] sm:$0xff]  ;;  %v2687_v37 = vld [vmem:[#allocation7] ss:$0 sm:$0xff] }
  0xe4   : > { %1836 = vmatprep.subr.bf16.mxu0 %v1835_v22  ;;  %1913 = vmatprep.subr.bf16.mxu1 %v1835_v22 }
  0xe7   : > { %1838 = vmatpush3.bf16.msra.mxu0 %v1835_v22  ;;  %1921 = vmatpush3.bf16.msra.mxu1 %v1835_v22  ;;  %v976_v22 = vld [vmem:[#allocation11 + $0x20] sm:$0xff] }
  0xe8   : > { %1840 = vmatprep.subr.bf16.mxu0 %v1839_v25  ;;  %1914 = vmatprep.subr.bf16.mxu1 %v1839_v25  ;;  %v1883_v24 = vpack.c.bf16 %v977_v23, %v976_v22 }
  0xeb   : > { %1842 = vmatpush3.bf16.msra.mxu0 %v1839_v25  ;;  %1922 = vmatpush3.bf16.msra.mxu1 %v1839_v25  ;;  %v978_v25 = vld [vmem:[#allocation11 + $0x30] sm:$0xff] }
  0xec   : > { %1844 = vmatprep.subr.bf16.mxu1 %v1843_v28  ;;  %1876 = vmatprep.subr.bf16.mxu0 %v1875_v19  ;;  %v1887_v27 = vpack.c.bf16 %v979_v26, %v978_v25 }
  0xee   : > { %1604 = vmatmul.mubr.f32.vlgmr.msra.gmra.mrb[0].mxu0 %v381_v31  ;;  %1628 = vmatmul.mubr.f32.vlgmr.msra.gmra.mrb[0].mxu1 %v397_v32  ;;  %v982_v31 = vld [vmem:[#allocation11 + $0x50] sm:$0xff]  ;;  %v983_v32 = vld [vmem:[#allocation11 + $0x58] sm:$0xff] }
  0xef   : > { %1606 = vmatprep.mubr.f32.mxu0 %v382_v33  ;;  %1630 = vmatprep.mubr.f32.mxu1 %v398_v34  ;;  %v1895_v33 = vpack.c.bf16 %v983_v32, %v982_v31  ;;  %v984_v34 = vld [vmem:[#allocation11 + $0x60] sm:$0xff] }
  0xf0   : > { %1846 = vmatpush3.bf16.msra.mxu1 %v1843_v28  ;;  %1878 = vmatpush3.bf16.msra.mxu0 %v1875_v19  ;;  %v980_v28 = vld [vmem:[#allocation11 + $0x40] sm:$0xff] }
  0xf1   : > { %1848 = vmatprep.subr.bf16.mxu1 %v1847_v35  ;;  %1880 = vmatprep.subr.bf16.mxu0 %v1879_v21  ;;  %v1891_v30 = vpack.c.bf16 %v981_v29, %v980_v28 }
  0xf2   : > { %1607 = vmatmul.mubr.f32.gmra.mrb[2].mxu0 %v383_v38  ;;  %1631 = vmatmul.mubr.f32.gmra.mrb[2].mxu1 %v399_v39 }
  0xf3   : > { %1609 = vmatprep.mubr.f32.mxu0 %v384_v40  ;;  %1633 = vmatprep.mubr.f32.mxu1 %v400_v41 }
  0xf4   : > { %1850 = vmatpush3.bf16.msra.mxu1 %v1847_v35  ;;  %1882 = vmatpush3.bf16.msra.mxu0 %v1879_v21  ;;  %v985_v35 = vld [vmem:[#allocation11 + $0x68] sm:$0xff] }
  0xf5   : > { %1852 = vmatprep.subr.bf16.mxu1 %v1851_v42  ;;  %1884 = vmatprep.subr.bf16.mxu0 %v1883_v24  ;;  %v1899_v36 = vpack.c.bf16 %v985_v35, %v984_v34 }
  0xf6   : > { %1610 = vmatmul.mubr.f32.gmra.mrb[4].mxu0 %v385_v45  ;;  %1634 = vmatmul.mubr.f32.gmra.mrb[4].mxu1 %v401_v46 }
  0xf7   : > { %1612 = vmatprep.mubr.f32.mxu0 %v386_v47  ;;  %1636 = vmatprep.mubr.f32.mxu1 %v402_v48 }
  0xf8   : > { %1854 = vmatpush3.bf16.msra.mxu1 %v1851_v42  ;;  %1886 = vmatpush3.bf16.msra.mxu0 %v1883_v24 }
  0xf9   : > { %1856 = vmatprep.subr.bf16.mxu1 %v1855_v49  ;;  %1888 = vmatprep.subr.bf16.mxu0 %v1887_v27 }
  0xfa   : > { %1613 = vmatmul.mubr.f32.gmra.mrb[6].mxu0 %v387_v52  ;;  %1637 = vmatmul.mubr.f32.gmra.mrb[6].mxu1 %v403_v53 }
  0xfb   : > { %1615 = vmatprep.mubr.f32.mxu0 %v388_v54  ;;  %1639 = vmatprep.mubr.f32.mxu1 %v404_v55 }
  0xfc   : > { %1858 = vmatpush3.bf16.msra.mxu1 %v1855_v49  ;;  %1890 = vmatpush3.bf16.msra.mxu0 %v1887_v27 }
  0xfd   : > { %1860 = vmatprep.subr.bf16.mxu1 %v1859_v56  ;;  %1892 = vmatprep.subr.bf16.mxu0 %v1891_v30 }
  0xfe   : > { %1616 = vmatmul.mubr.f32.gmra.mrb[8].mxu0 %v389_v59  ;;  %1640 = vmatmul.mubr.f32.gmra.mrb[8].mxu1 %v405_v60 }
  0xff   : > { %1618 = vmatprep.mubr.f32.mxu0 %v390_v61  ;;  %1642 = vmatprep.mubr.f32.mxu1 %v406_v62 }
 0x100   : > { %1862 = vmatpush3.bf16.msra.mxu1 %v1859_v56  ;;  %1894 = vmatpush3.bf16.msra.mxu0 %v1891_v30 }
 0x101   : > { %1864 = vmatprep.subr.bf16.mxu1 %v1863_v63  ;;  %1896 = vmatprep.subr.bf16.mxu0 %v1895_v33 }
 0x102   : > { %1619 = vmatmul.mubr.f32.gmra.mrb[10].mxu0 %v391_v2  ;;  %1643 = vmatmul.mubr.f32.gmra.mrb[10].mxu1 %v407_v3 }
 0x103   : > { %1621 = vmatprep.mubr.f32.mxu0 %v392_v4  ;;  %1645 = vmatprep.mubr.f32.mxu1 %v408_v5 }
 0x104   : > { %1866 = vmatpush3.bf16.msra.mxu1 %v1863_v63  ;;  %1898 = vmatpush3.bf16.msra.mxu0 %v1895_v33 }
 0x105   : > { %1868 = vmatprep.subr.bf16.mxu1 %v1867_v6  ;;  %1900 = vmatprep.subr.bf16.mxu0 %v1899_v36 }
 0x106   : > { %1622 = vmatmul.mubr.f32.gmra.mrb[12].mxu0 %v393_v7  ;;  %1646 = vmatmul.mubr.f32.gmra.mrb[12].mxu1 %v409_v8 }
 0x107   : > { %1624 = vmatprep.mubr.f32.mxu0 %v394_v9  ;;  %1648 = vmatprep.mubr.f32.mxu1 %v410_v10 }
 0x108   : > { %1870 = vmatpush3.bf16.msra.mxu1 %v1867_v6  ;;  %1902 = vmatpush3.bf16.msra.mxu0 %v1899_v36 }
 0x109   : > { %1872 = vmatprep.subr.bf16.mxu1 %v1871_v15 }
 0x10a   : > { %1625 = vmatmul.mubr.f32.gmra.mrb[14].mxu0 %v395_v11  ;;  %1649 = vmatmul.mubr.f32.gmra.mrb[14].mxu1 %v411_v12 }
 0x10c   : > { %1874 = vmatpush3.bf16.msra.mxu1 %v1871_v15 }
 0x1c1   : > { %v1605_v38 = vpop.f32.mrb[0].mxu0  ;;  %v2689_v39 = vpop.f32.mrb[0].mxu1 }
 0x1c2   : > { %v507_v40 = vadd.f32 %v1605_v38, %v2687_v37  ;;  %v501_v41 = vpop.f32.mrb[1].mxu0  ;;  %v2692_v42 = vpop.f32.mrb[1].mxu1 }
 0x1c3   : > { %v502_v43 = vadd.f32 %v2687_v37, %v501_v41  ;;  %v582_v30 = vadd.f32 %v2687_v37, %v2692_v42 }
 0x1c4   : > { %v661_v47 = vmax.f32 %v507_v40, 0.0 }
 0x1c5   : > { %v660_v44 = vmax.f32 %v502_v43, 0.0  ;;  %v1608_v45 = vpop.f32.mrb[2].mxu0  ;;  %v2695_v46 = vpop.f32.mrb[2].mxu1  ;;  %v676_v40 = vmax.f32 %v582_v30, 0.0 }
 0x1c6   : > { %v517_v48 = vadd.f32 %v1608_v45, %v2687_v37  ;;  %v511_v49 = vpop.f32.mrb[3].mxu0  ;;  %v2698_v50 = vpop.f32.mrb[3].mxu1 }
 0x1c7   : > { %v512_v51 = vadd.f32 %v2687_v37, %v511_v49  ;;  %1683 = vmatprep.mubr.f32.mxu1 %v660_v44  ;;  %v592_v41 = vadd.f32 %v2687_v37, %v2698_v50  ;;  %v587_v44 = vadd.f32 %v2689_v39, %v2687_v37 }
 0x1c8   : > { %1684 = vmatmul.mubr.f32.vlgmr.msra.gmra.mrb[16].mxu1 %v661_v47  ;;  %v663_v55 = vmax.f32 %v517_v48, 0.0  ;;  %v597_v48 = vadd.f32 %v2695_v46, %v2687_v37 }
 0x1c9   : > { %v662_v52 = vmax.f32 %v512_v51, 0.0  ;;  %v1611_v53 = vpop.f32.mrb[4].mxu0  ;;  %v2701_v54 = vpop.f32.mrb[4].mxu1  ;;  %v678_v42 = vmax.f32 %v592_v41, 0.0  ;;  %v677_v47 = vmax.f32 %v587_v44, 0.0 }
 0x1ca   : > { %v527_v56 = vadd.f32 %v1611_v53, %v2687_v37  ;;  %v521_v57 = vpop.f32.mrb[5].mxu0  ;;  %v2704_v58 = vpop.f32.mrb[5].mxu1  ;;  %v679_v51 = vmax.f32 %v597_v48, 0.0  ;;  %v607_v39 = vadd.f32 %v2701_v54, %v2687_v37 }
 0x1cb   : > { %v522_v59 = vadd.f32 %v2687_v37, %v521_v57  ;;  %1686 = vmatprep.mubr.f32.mxu1 %v662_v52  ;;  %v602_v45 = vadd.f32 %v2687_v37, %v2704_v58 }
 0x1cc   : > { %1687 = vmatmul.mubr.f32.gmra.mrb[18].mxu1 %v663_v55  ;;  %v665_v63 = vmax.f32 %v527_v56, 0.0  ;;  %v681_v55 = vmax.f32 %v607_v39, 0.0 }
 0x1cd   : > { %v664_v60 = vmax.f32 %v522_v59, 0.0  ;;  %v1614_v61 = vpop.f32.mrb[6].mxu0  ;;  %v2707_v62 = vpop.f32.mrb[6].mxu1  ;;  %v680_v49 = vmax.f32 %v602_v45, 0.0 }
 0x1ce   : > { %v537_v0 = vadd.f32 %v1614_v61, %v2687_v37  ;;  %v531_v1 = vpop.f32.mrb[7].mxu0  ;;  %v611_v2 = vpop.f32.mrb[7].mxu1  ;;  %v617_v56 = vadd.f32 %v2707_v62, %v2687_v37 }
 0x1cf   : > { %v532_v3 = vadd.f32 %v2687_v37, %v531_v1  ;;  %1689 = vmatprep.mubr.f32.mxu1 %v664_v60  ;;  %v612_v50 = vadd.f32 %v2687_v37, %v611_v2 }
 0x1d0   : > { %1690 = vmatmul.mubr.f32.gmra.mrb[20].mxu1 %v665_v63  ;;  %v667_v7 = vmax.f32 %v537_v0, 0.0  ;;  %v683_v58 = vmax.f32 %v617_v56, 0.0 }
 0x1d1   : > { %v666_v4 = vmax.f32 %v532_v3, 0.0  ;;  %v1617_v5 = vpop.f32.mrb[8].mxu0  ;;  %v2711_v6 = vpop.f32.mrb[8].mxu1  ;;  %v682_v52 = vmax.f32 %v612_v50, 0.0 }
 0x1d2   : > { %v547_v8 = vadd.f32 %v1617_v5, %v2687_v37  ;;  %v541_v9 = vpop.f32.mrb[9].mxu0  ;;  %v621_v10 = vpop.f32.mrb[9].mxu1  ;;  %v627_v59 = vadd.f32 %v2711_v6, %v2687_v37 }
 0x1d3   : > { %v542_v11 = vadd.f32 %v2687_v37, %v541_v9  ;;  %1692 = vmatprep.mubr.f32.mxu1 %v666_v4  ;;  %v622_v53 = vadd.f32 %v2687_v37, %v621_v10  ;;  %v2748_v10 = vld [vmem:[#allocation10] ss:$0 sm:$0xff] }
 0x1d4   : > { %1693 = vmatmul.mubr.f32.gmra.mrb[22].mxu1 %v667_v7  ;;  %v669_v15 = vmax.f32 %v547_v8, 0.0  ;;  %v685_v61 = vmax.f32 %v627_v59, 0.0  ;;  %v986_v7 = vld [vmem:[#allocation11 + $0x70] sm:$0xff]  ;;  %v987_v8 = vld [vmem:[#allocation11 + $0x78] sm:$0xff] }
 0x1d5   : > { %v668_v12 = vmax.f32 %v542_v11, 0.0  ;;  %v1620_v13 = vpop.f32.mrb[10].mxu0  ;;  %v2715_v14 = vpop.f32.mrb[10].mxu1  ;;  %v684_v46 = vmax.f32 %v622_v53, 0.0  ;;  %v1903_v9 = vpack.c.bf16 %v987_v8, %v986_v7 }
 0x1d6   : > { %v557_v16 = vadd.f32 %v1620_v13, %v2687_v37  ;;  %v551_v17 = vpop.f32.mrb[11].mxu0  ;;  %v631_v18 = vpop.f32.mrb[11].mxu1  ;;  %v637_v63 = vadd.f32 %v2715_v14, %v2687_v37 }
 0x1d7   : > { %v552_v19 = vadd.f32 %v2687_v37, %v551_v17  ;;  %1695 = vmatprep.mubr.f32.mxu1 %v668_v12  ;;  %v632_v57 = vadd.f32 %v2687_v37, %v631_v18  ;;  %1904 = vmatprep.subr.bf16.mxu0 %v1903_v9 }
 0x1d8   : > { %1696 = vmatmul.mubr.f32.gmra.mrb[24].mxu1 %v669_v15  ;;  %v671_v23 = vmax.f32 %v557_v16, 0.0  ;;  %v687_v1 = vmax.f32 %v637_v63, 0.0  ;;  %1906 = vmatpush3.bf16.msra.mxu0 %v1903_v9 }
 0x1d9   : > { %v670_v20 = vmax.f32 %v552_v19, 0.0  ;;  %v1623_v21 = vpop.f32.mrb[12].mxu0  ;;  %v1647_v22 = vpop.f32.mrb[12].mxu1  ;;  %v686_v54 = vmax.f32 %v632_v57, 0.0 }
 0x1da   : > { %v567_v24 = vadd.f32 %v1623_v21, %v2687_v37  ;;  %v561_v25 = vpop.f32.mrb[13].mxu0  ;;  %v641_v26 = vpop.f32.mrb[13].mxu1  ;;  %v647_v2 = vadd.f32 %v1647_v22, %v2687_v37 }
 0x1db   : > { %v562_v27 = vadd.f32 %v2687_v37, %v561_v25  ;;  %1698 = vmatprep.mubr.f32.mxu1 %v670_v20  ;;  %v642_v60 = vadd.f32 %v2687_v37, %v641_v26 }
 0x1dc   : > { %1699 = vmatmul.mubr.f32.gmra.mrb[26].mxu1 %v671_v23  ;;  %v673_v32 = vmax.f32 %v567_v24, 0.0  ;;  %v689_v4 = vmax.f32 %v647_v2, 0.0 }
 0x1dd   : > { %v672_v28 = vmax.f32 %v562_v27, 0.0  ;;  %v1626_v29 = vpop.f32.mrb[14].mxu0  ;;  %v1650_v31 = vpop.f32.mrb[14].mxu1  ;;  %v688_v62 = vmax.f32 %v642_v60, 0.0 }
 0x1de   : > { %v577_v33 = vadd.f32 %v1626_v29, %v2687_v37  ;;  %v571_v34 = vpop.f32.mrb[15].mxu0  ;;  %v651_v35 = vpop.f32.mrb[15].mxu1  ;;  %v657_v5 = vadd.f32 %v1650_v31, %v2687_v37 }
 0x1df   : > { %v572_v36 = vadd.f32 %v2687_v37, %v571_v34  ;;  %1701 = vmatprep.mubr.f32.mxu1 %v672_v28  ;;  %v652_v0 = vadd.f32 %v2687_v37, %v651_v35 }
 0x1e0   : > { %1702 = vmatmul.mubr.f32.gmra.mrb[28].mxu1 %v673_v32  ;;  %v675_v43 = vmax.f32 %v577_v33, 0.0  ;;  %v691_v6 = vmax.f32 %v657_v5, 0.0 }
 0x1e1   : > { %v674_v38 = vmax.f32 %v572_v36, 0.0  ;;  %v690_v3 = vmax.f32 %v652_v0, 0.0 }
 0x1e3   : > { %1704 = vmatprep.mubr.f32.mxu1 %v674_v38 }
 0x1e4   : > { %1705 = vmatmul.mubr.f32.gmra.mrb[30].mxu1 %v675_v43 }
 0x1e5   : > { %1707 = vmatprep.mubr.f32.mxu1 %v676_v40 }
 0x1e8   : > { %1708 = vmatmul.mubr.f32.gmra.mrb[32].mxu1 %v677_v47 }
 0x1e9   : > { %1710 = vmatprep.mubr.f32.mxu1 %v678_v42 }
 0x1ec   : > { %1711 = vmatmul.mubr.f32.gmra.mrb[34].mxu1 %v679_v51 }
 0x1ed   : > { %1713 = vmatprep.mubr.f32.mxu1 %v680_v49 }
 0x1f0   : > { %1714 = vmatmul.mubr.f32.gmra.mrb[36].mxu1 %v681_v55 }
 0x1f1   : > { %1716 = vmatprep.mubr.f32.mxu1 %v682_v52 }
 0x1f4   : > { %1717 = vmatmul.mubr.f32.gmra.mrb[38].mxu1 %v683_v58 }
 0x1f5   : > { %1719 = vmatprep.mubr.f32.mxu1 %v684_v46 }
 0x1f8   : > { %1720 = vmatmul.mubr.f32.gmra.mrb[40].mxu1 %v685_v61 }
 0x1f9   : > { %1722 = vmatprep.mubr.f32.mxu1 %v686_v54 }
 0x1fc   : > { %1723 = vmatmul.mubr.f32.gmra.mrb[42].mxu1 %v687_v1 }
 0x1fd   : > { %1725 = vmatprep.mubr.f32.mxu1 %v688_v62 }
 0x200   : > { %1726 = vmatmul.mubr.f32.gmra.mrb[44].mxu1 %v689_v4 }
 0x201   : > { %1728 = vmatprep.mubr.f32.mxu1 %v690_v3 }
 0x204   : > { %1729 = vmatmul.mubr.f32.gmra.mrb[46].mxu1 %v691_v6 }
 0x29b   : > { %v1685_v11 = vpop.f32.mrb[16].mxu1 }
 0x29c   : > { %v787_v12 = vadd.f32 %v1685_v11, %v2748_v10  ;;  %v781_v13 = vpop.f32.mrb[17].mxu1 }
 0x29d   : > { %v782_v14 = vadd.f32 %v2748_v10, %v781_v13 }
 0x29e   : > { %v941_v37 = vmax.f32 %v787_v12, 0.0 }
 0x29f   : > { %v940_v15 = vmax.f32 %v782_v14, 0.0  ;;  %v1688_v16 = vpop.f32.mrb[18].mxu1 }
 0x2a0   : > { %v797_v17 = vadd.f32 %v1688_v16, %v2748_v10  ;;  %v791_v18 = vpop.f32.mrb[19].mxu1 }
 0x2a1   : > { %v792_v19 = vadd.f32 %v2748_v10, %v791_v18  ;;  %1763 = vmatprep.mubr.f32.mxu0 %v940_v15 }
 0x2a2   : > { %1764 = vmatmul.mubr.f32.vlgmr.msra.gmra.mrb[16].mxu0 %v941_v37  ;;  %v943_v22 = vmax.f32 %v797_v17, 0.0 }
 0x2a3   : > { %v942_v20 = vmax.f32 %v792_v19, 0.0  ;;  %v1691_v21 = vpop.f32.mrb[20].mxu1 }
 0x2a4   : > { %v807_v23 = vadd.f32 %v1691_v21, %v2748_v10  ;;  %v801_v24 = vpop.f32.mrb[21].mxu1 }
 0x2a5   : > { %v802_v25 = vadd.f32 %v2748_v10, %v801_v24  ;;  %1766 = vmatprep.mubr.f32.mxu0 %v942_v20 }
 0x2a6   : > { %1767 = vmatmul.mubr.f32.gmra.mrb[18].mxu0 %v943_v22  ;;  %v945_v28 = vmax.f32 %v807_v23, 0.0 }
 0x2a7   : > { %v944_v26 = vmax.f32 %v802_v25, 0.0  ;;  %v1694_v27 = vpop.f32.mrb[22].mxu1 }
 0x2a8   : > { %v817_v29 = vadd.f32 %v1694_v27, %v2748_v10  ;;  %v811_v30 = vpop.f32.mrb[23].mxu1 }
 0x2a9   : > { %v812_v31 = vadd.f32 %v2748_v10, %v811_v30  ;;  %1769 = vmatprep.mubr.f32.mxu0 %v944_v26 }
 0x2aa   : > { %1770 = vmatmul.mubr.f32.gmra.mrb[20].mxu0 %v945_v28  ;;  %v947_v34 = vmax.f32 %v817_v29, 0.0 }
 0x2ab   : > { %v946_v32 = vmax.f32 %v812_v31, 0.0  ;;  %v1697_v33 = vpop.f32.mrb[24].mxu1 }
 0x2ac   : > { %v827_v35 = vadd.f32 %v1697_v33, %v2748_v10  ;;  %v821_v36 = vpop.f32.mrb[25].mxu1 }
 0x2ad   : > { %v822_v38 = vadd.f32 %v2748_v10, %v821_v36  ;;  %1772 = vmatprep.mubr.f32.mxu0 %v946_v32 }
 0x2ae   : > { %1773 = vmatmul.mubr.f32.gmra.mrb[22].mxu0 %v947_v34  ;;  %v949_v43 = vmax.f32 %v827_v35, 0.0 }
 0x2af   : > { %v948_v40 = vmax.f32 %v822_v38, 0.0  ;;  %v1700_v41 = vpop.f32.mrb[26].mxu1 }
 0x2b0   : > { %v837_v44 = vadd.f32 %v1700_v41, %v2748_v10  ;;  %v831_v42 = vpop.f32.mrb[27].mxu1 }
 0x2b1   : > { %v832_v45 = vadd.f32 %v2748_v10, %v831_v42  ;;  %1775 = vmatprep.mubr.f32.mxu0 %v948_v40 }
 0x2b2   : > { %1776 = vmatmul.mubr.f32.gmra.mrb[24].mxu0 %v949_v43  ;;  %v951_v49 = vmax.f32 %v837_v44, 0.0 }
 0x2b3   : > { %v950_v47 = vmax.f32 %v832_v45, 0.0  ;;  %v1703_v48 = vpop.f32.mrb[28].mxu1  ;;  %v2782_v45 = vld [vmem:[#allocation13] ss:$0 sm:$0xff] }
 0x2b4   : > { %v847_v50 = vadd.f32 %v1703_v48, %v2748_v10  ;;  %v841_v51 = vpop.f32.mrb[29].mxu1 }
 0x2b5   : > { %v842_v39 = vadd.f32 %v2748_v10, %v841_v51  ;;  %1778 = vmatprep.mubr.f32.mxu0 %v950_v47 }
 0x2b6   : > { %1779 = vmatmul.mubr.f32.gmra.mrb[26].mxu0 %v951_v49  ;;  %v953_v55 = vmax.f32 %v847_v50, 0.0 }
 0x2b7   : > { %v952_v52 = vmax.f32 %v842_v39, 0.0  ;;  %v1706_v53 = vpop.f32.mrb[30].mxu1 }
 0x2b8   : > { %v857_v56 = vadd.f32 %v1706_v53, %v2748_v10  ;;  %v851_v46 = vpop.f32.mrb[31].mxu1 }
 0x2b9   : > { %v852_v57 = vadd.f32 %v2748_v10, %v851_v46  ;;  %1781 = vmatprep.mubr.f32.mxu0 %v952_v52 }
 0x2ba   : > { %1782 = vmatmul.mubr.f32.gmra.mrb[28].mxu0 %v953_v55  ;;  %v955_v54 = vmax.f32 %v857_v56, 0.0 }
 0x2bb   : > { %v954_v58 = vmax.f32 %v852_v57, 0.0  ;;  %v1709_v59 = vpop.f32.mrb[32].mxu1 }
 0x2bc   : > { %v867_v60 = vadd.f32 %v1709_v59, %v2748_v10  ;;  %v861_v61 = vpop.f32.mrb[33].mxu1 }
 0x2bd   : > { %v862_v63 = vadd.f32 %v2748_v10, %v861_v61  ;;  %1784 = vmatprep.mubr.f32.mxu0 %v954_v58 }
 0x2be   : > { %1785 = vmatmul.mubr.f32.gmra.mrb[30].mxu0 %v955_v54  ;;  %v957_v1 = vmax.f32 %v867_v60, 0.0 }
 0x2bf   : > { %v956_v62 = vmax.f32 %v862_v63, 0.0  ;;  %v1712_v0 = vpop.f32.mrb[34].mxu1 }
 0x2c0   : > { %v877_v2 = vadd.f32 %v1712_v0, %v2748_v10  ;;  %v871_v3 = vpop.f32.mrb[35].mxu1 }
 0x2c1   : > { %v872_v4 = vadd.f32 %v2748_v10, %v871_v3  ;;  %1787 = vmatprep.mubr.f32.mxu0 %v956_v62 }
 0x2c2   : > { %1788 = vmatmul.mubr.f32.gmra.mrb[32].mxu0 %v957_v1  ;;  %v959_v7 = vmax.f32 %v877_v2, 0.0 }
 0x2c3   : > { %v958_v5 = vmax.f32 %v872_v4, 0.0  ;;  %v1715_v6 = vpop.f32.mrb[36].mxu1 }
 0x2c4   : > { %v887_v8 = vadd.f32 %v1715_v6, %v2748_v10  ;;  %v881_v9 = vpop.f32.mrb[37].mxu1 }
 0x2c5   : > { %v882_v11 = vadd.f32 %v2748_v10, %v881_v9  ;;  %1790 = vmatprep.mubr.f32.mxu0 %v958_v5 }
 0x2c6   : > { %1791 = vmatmul.mubr.f32.gmra.mrb[34].mxu0 %v959_v7  ;;  %v961_v14 = vmax.f32 %v887_v8, 0.0 }
 0x2c7   : > { %v960_v12 = vmax.f32 %v882_v11, 0.0  ;;  %v1718_v13 = vpop.f32.mrb[38].mxu1 }
 0x2c8   : > { %v897_v15 = vadd.f32 %v1718_v13, %v2748_v10  ;;  %v891_v16 = vpop.f32.mrb[39].mxu1 }
 0x2c9   : > { %v892_v37 = vadd.f32 %v2748_v10, %v891_v16  ;;  %1793 = vmatprep.mubr.f32.mxu0 %v960_v12 }
 0x2ca   : > { %1794 = vmatmul.mubr.f32.gmra.mrb[36].mxu0 %v961_v14  ;;  %v963_v19 = vmax.f32 %v897_v15, 0.0 }
 0x2cb   : > { %v962_v17 = vmax.f32 %v892_v37, 0.0  ;;  %v1721_v18 = vpop.f32.mrb[40].mxu1 }
 0x2cc   : > { %v907_v20 = vadd.f32 %v1721_v18, %v2748_v10  ;;  %v901_v21 = vpop.f32.mrb[41].mxu1 }
 0x2cd   : > { %v902_v22 = vadd.f32 %v2748_v10, %v901_v21  ;;  %1796 = vmatprep.mubr.f32.mxu0 %v962_v17 }
 0x2ce   : > { %1797 = vmatmul.mubr.f32.gmra.mrb[38].mxu0 %v963_v19  ;;  %v965_v25 = vmax.f32 %v907_v20, 0.0 }
 0x2cf   : > { %v964_v23 = vmax.f32 %v902_v22, 0.0  ;;  %v1724_v24 = vpop.f32.mrb[42].mxu1 }
 0x2d0   : > { %v917_v26 = vadd.f32 %v1724_v24, %v2748_v10  ;;  %v911_v27 = vpop.f32.mrb[43].mxu1 }
 0x2d1   : > { %v912_v28 = vadd.f32 %v2748_v10, %v911_v27  ;;  %1799 = vmatprep.mubr.f32.mxu0 %v964_v23 }
 0x2d2   : > { %1800 = vmatmul.mubr.f32.gmra.mrb[40].mxu0 %v965_v25  ;;  %v967_v31 = vmax.f32 %v917_v26, 0.0 }
 0x2d3   : > { %v966_v29 = vmax.f32 %v912_v28, 0.0  ;;  %v1727_v30 = vpop.f32.mrb[44].mxu1 }
 0x2d4   : > { %v927_v32 = vadd.f32 %v1727_v30, %v2748_v10  ;;  %v921_v33 = vpop.f32.mrb[45].mxu1 }
 0x2d5   : > { %v922_v34 = vadd.f32 %v2748_v10, %v921_v33  ;;  %1802 = vmatprep.mubr.f32.mxu0 %v966_v29 }
 0x2d6   : > { %1803 = vmatmul.mubr.f32.gmra.mrb[42].mxu0 %v967_v31  ;;  %v969_v38 = vmax.f32 %v927_v32, 0.0 }
 0x2d7   : > { %v968_v35 = vmax.f32 %v922_v34, 0.0  ;;  %v1730_v36 = vpop.f32.mrb[46].mxu1 }
 0x2d8   : > { %v937_v40 = vadd.f32 %v1730_v36, %v2748_v10  ;;  %v931_v41 = vpop.f32.mrb[47].mxu1 }
 0x2d9   : > { %v932_v43 = vadd.f32 %v2748_v10, %v931_v41  ;;  %1805 = vmatprep.mubr.f32.mxu0 %v968_v35 }
 0x2da   : > { %1806 = vmatmul.mubr.f32.gmra.mrb[44].mxu0 %v969_v38  ;;  %v971_v42 = vmax.f32 %v937_v40, 0.0 }
 0x2db   : > { %v970_v44 = vmax.f32 %v932_v43, 0.0 }
 0x2dd   : > { %1808 = vmatprep.mubr.f32.mxu0 %v970_v44 }
 0x2de   : > { %1809 = vmatmul.mubr.f32.gmra.mrb[46].mxu0 %v971_v42 }
 0x375   : > { %v1765_v47 = vpop.f32.mrb[16].mxu0 }
 0x376   : > { %v1067_v48 = vadd.f32 %v1765_v47, %v2782_v45  ;;  %v1061_v49 = vpop.f32.mrb[17].mxu0 }
 0x377   : > { %v1062_v50 = vadd.f32 %v2782_v45, %v1061_v49 }
 0x378   : > { %1221 = vst [vmem:[%s2788_s8 + $0x8] sm:$0xff] %v1067_v48 }
 0x379   : > { %1220 = vst [vmem:[%s2788_s8] sm:$0xff] %v1062_v50  ;;  %v1768_v10 = vpop.f32.mrb[18].mxu0 }
 0x37a   : > { %v1077_v51 = vadd.f32 %v1768_v10, %v2782_v45  ;;  %v1071_v39 = vpop.f32.mrb[19].mxu0 }
 0x37b   : > { %v1072_v52 = vadd.f32 %v2782_v45, %v1071_v39 }
 0x37c   : > { %1223 = vst [vmem:[%s2788_s8 + $0x18] sm:$0xff] %v1077_v51 }
 0x37d   : > { %1222 = vst [vmem:[%s2788_s8 + $0x10] sm:$0xff] %v1072_v52  ;;  %v1771_v53 = vpop.f32.mrb[20].mxu0 }
 0x37e   : > { %v1087_v55 = vadd.f32 %v1771_v53, %v2782_v45  ;;  %v1081_v56 = vpop.f32.mrb[21].mxu0 }
 0x37f   : > { %v1082_v46 = vadd.f32 %v2782_v45, %v1081_v56 }
 0x380   : > { %1225 = vst [vmem:[%s2788_s8 + $0x28] sm:$0xff] %v1087_v55 }
 0x381   : > { %1224 = vst [vmem:[%s2788_s8 + $0x20] sm:$0xff] %v1082_v46  ;;  %v1774_v57 = vpop.f32.mrb[22].mxu0 }
 0x382   : > { %v1097_v58 = vadd.f32 %v1774_v57, %v2782_v45  ;;  %v1091_v59 = vpop.f32.mrb[23].mxu0 }
 0x383   : > { %v1092_v54 = vadd.f32 %v2782_v45, %v1091_v59 }
 0x384   : > { %1227 = vst [vmem:[%s2788_s8 + $0x38] sm:$0xff] %v1097_v58 }
 0x385   : > { %1226 = vst [vmem:[%s2788_s8 + $0x30] sm:$0xff] %v1092_v54  ;;  %v1777_v60 = vpop.f32.mrb[24].mxu0 }
 0x386   : > { %v1107_v61 = vadd.f32 %v1777_v60, %v2782_v45  ;;  %v1101_v63 = vpop.f32.mrb[25].mxu0 }
 0x387   : > { %v1102_v62 = vadd.f32 %v2782_v45, %v1101_v63 }
 0x388   : > { %1229 = vst [vmem:[%s2788_s8 + $0x48] sm:$0xff] %v1107_v61 }
 0x389   : > { %1228 = vst [vmem:[%s2788_s8 + $0x40] sm:$0xff] %v1102_v62  ;;  %v1780_v0 = vpop.f32.mrb[26].mxu0 }
 0x38a   : > { %v1117_v1 = vadd.f32 %v1780_v0, %v2782_v45  ;;  %v1111_v2 = vpop.f32.mrb[27].mxu0 }
 0x38b   : > { %v1112_v3 = vadd.f32 %v2782_v45, %v1111_v2 }
 0x38c   : > { %1231 = vst [vmem:[%s2788_s8 + $0x58] sm:$0xff] %v1117_v1 }
 0x38d   : > { %1230 = vst [vmem:[%s2788_s8 + $0x50] sm:$0xff] %v1112_v3  ;;  %v1783_v4 = vpop.f32.mrb[28].mxu0 }
 0x38e   : > { %v1127_v5 = vadd.f32 %v1783_v4, %v2782_v45  ;;  %v1121_v6 = vpop.f32.mrb[29].mxu0 }
 0x38f   : > { %v1122_v7 = vadd.f32 %v2782_v45, %v1121_v6 }
 0x390   : > { %1233 = vst [vmem:[%s2788_s8 + $0x68] sm:$0xff] %v1127_v5 }
 0x391   : > { %1232 = vst [vmem:[%s2788_s8 + $0x60] sm:$0xff] %v1122_v7  ;;  %v1786_v8 = vpop.f32.mrb[30].mxu0 }
 0x392   : > { %v1137_v9 = vadd.f32 %v1786_v8, %v2782_v45  ;;  %v1131_v11 = vpop.f32.mrb[31].mxu0 }
 0x393   : > { %v1132_v12 = vadd.f32 %v2782_v45, %v1131_v11 }
 0x394   : > { %1235 = vst [vmem:[%s2788_s8 + $0x78] sm:$0xff] %v1137_v9 }
 0x395   : > { %1234 = vst [vmem:[%s2788_s8 + $0x70] sm:$0xff] %v1132_v12  ;;  %v1789_v13 = vpop.f32.mrb[32].mxu0 }
 0x396   : > { %v1147_v14 = vadd.f32 %v1789_v13, %v2782_v45  ;;  %v1141_v15 = vpop.f32.mrb[33].mxu0 }
 0x397   : > { %v1142_v16 = vadd.f32 %v2782_v45, %v1141_v15 }
 0x398   : > { %1237 = vst [vmem:[%s2788_s8 + $0x88] sm:$0xff] %v1147_v14 }
 0x399   : > { %1236 = vst [vmem:[%s2788_s8 + $0x80] sm:$0xff] %v1142_v16  ;;  %v1792_v37 = vpop.f32.mrb[34].mxu0 }
 0x39a   : > { %v1157_v17 = vadd.f32 %v1792_v37, %v2782_v45  ;;  %v1151_v18 = vpop.f32.mrb[35].mxu0 }
 0x39b   : > { %v1152_v19 = vadd.f32 %v2782_v45, %v1151_v18 }
 0x39c   : > { %1239 = vst [vmem:[%s2788_s8 + $0x98] sm:$0xff] %v1157_v17 }
 0x39d   : > { %1238 = vst [vmem:[%s2788_s8 + $0x90] sm:$0xff] %v1152_v19  ;;  %v1795_v20 = vpop.f32.mrb[36].mxu0 }
 0x39e   : > { %v1167_v21 = vadd.f32 %v1795_v20, %v2782_v45  ;;  %v1161_v22 = vpop.f32.mrb[37].mxu0 }
 0x39f   : > { %v1162_v23 = vadd.f32 %v2782_v45, %v1161_v22 }
 0x3a0   : > { %1241 = vst [vmem:[%s2788_s8 + $0xa8] sm:$0xff] %v1167_v21 }
 0x3a1   : > { %1240 = vst [vmem:[%s2788_s8 + $0xa0] sm:$0xff] %v1162_v23  ;;  %v1798_v24 = vpop.f32.mrb[38].mxu0 }
 0x3a2   : > { %v1177_v25 = vadd.f32 %v1798_v24, %v2782_v45  ;;  %v1171_v26 = vpop.f32.mrb[39].mxu0 }
 0x3a3   : > { %v1172_v27 = vadd.f32 %v2782_v45, %v1171_v26 }
 0x3a4   : > { %1243 = vst [vmem:[%s2788_s8 + $0xb8] sm:$0xff] %v1177_v25 }
 0x3a5   : > { %1242 = vst [vmem:[%s2788_s8 + $0xb0] sm:$0xff] %v1172_v27  ;;  %v1801_v28 = vpop.f32.mrb[40].mxu0 }
 0x3a6   : > { %v1187_v29 = vadd.f32 %v1801_v28, %v2782_v45  ;;  %v1181_v30 = vpop.f32.mrb[41].mxu0 }
 0x3a7   : > { %v1182_v31 = vadd.f32 %v2782_v45, %v1181_v30 }
 0x3a8   : > { %1245 = vst [vmem:[%s2788_s8 + $0xc8] sm:$0xff] %v1187_v29 }
 0x3a9   : > { %1244 = vst [vmem:[%s2788_s8 + $0xc0] sm:$0xff] %v1182_v31  ;;  %v1804_v32 = vpop.f32.mrb[42].mxu0 }
 0x3aa   : > { %v1197_v33 = vadd.f32 %v1804_v32, %v2782_v45  ;;  %v1191_v34 = vpop.f32.mrb[43].mxu0 }
 0x3ab   : > { %v1192_v35 = vadd.f32 %v2782_v45, %v1191_v34 }
 0x3ac   : > { %1247 = vst [vmem:[%s2788_s8 + $0xd8] sm:$0xff] %v1197_v33 }
 0x3ad   : > { %1246 = vst [vmem:[%s2788_s8 + $0xd0] sm:$0xff] %v1192_v35  ;;  %v1807_v36 = vpop.f32.mrb[44].mxu0 }
 0x3ae   : > { %v1207_v38 = vadd.f32 %v1807_v36, %v2782_v45  ;;  %v1201_v40 = vpop.f32.mrb[45].mxu0 }
 0x3af   : > { %v1202_v41 = vadd.f32 %v2782_v45, %v1201_v40 }
 0x3b0   : > { %1249 = vst [vmem:[%s2788_s8 + $0xe8] sm:$0xff] %v1207_v38 }
 0x3b1   : > { %1248 = vst [vmem:[%s2788_s8 + $0xe0] sm:$0xff] %v1202_v41  ;;  %v1810_v43 = vpop.f32.mrb[46].mxu0 }
 0x3b2   : > { %v1217_v44 = vadd.f32 %v1810_v43, %v2782_v45  ;;  %v1211_v42 = vpop.f32.mrb[47].mxu0 }
 0x3b3   : > { %v1212_v47 = vadd.f32 %v2782_v45, %v1211_v42 }
 0x3b4   : > { %1251 = vst [vmem:[%s2788_s8 + $0xf8] sm:$0xff] %v1217_v44 }
 0x3b5   : > { %1250 = vst [vmem:[%s2788_s8 + $0xf0] sm:$0xff] %v1212_v47 }
 0x3b6   : > { %2245 = shalt.err (!%p2242_p8)
}
 0x3b7   : > { %s2246_s19 = scalar_lea.hbm %s2854_s12, 4096  ;;  %s2250_s8 = scalar_lea.hbm %s2910_s7, 8192 }
 0x3b8   : > { %p2247_p4 = scmp.ne.s32.totalorder %s2854_s12, %s2246_s19  ;;  %p2251_p0 = scmp.lt.u32.totalorder %s2854_s12, %s2910_s7 }
 0x3b9   : > { %p2252_p5 = scmp.lt.u32.totalorder %s2250_s8, %s2246_s19  ;;  %p2254_p6 = scmp.lt.u32.totalorder %s2246_s19, %s2854_s12 }
 0x3ba   : > { %p2248_p10 = pnand %p2247_p4, %p2932_p9 }
 0x3bb   : > { %p2253_p7 = por %p2252_p5, %p2251_p0 }
 0x3bc   : > { %p2249_p11 = pneg %p2248_p10 }
 0x3bd   : > { %p2255_p12 = por %p2254_p6, %p2253_p7 }
 0x3bf   : > { %p2256_p13 = pnand %p2255_p12, %p2249_p11 }
 0x3c1   : > { %2259 = shalt.err (!%p2256_p13)
}
 0x3c2   : > { %s2322_s22 = smov 128   ;;  %s2323_s13 = smov 8  }
 0x3c3   : > { %1949 = dma.vmem_to_hbm [thread:$0]  (%p2932_p9), %s2856_s28, 4096, %s2854_s12, %s1253_s30, %s2322_s22, %s2322_s22, %s2323_s13  }
 0x3c4 PF: > { %s1281_s14 = sand.u32 1, %s2298_s24   ;;  %p2933_p1 = scmp.ne.s32.totalorder %s2922_s21, 0 }
 0x3c5   : > { %p2934_p3 = scmp.ge.s32.totalorder %s2310_s27, 2  ;;  %s1282_s29 = scalar_lea.sflag [#allocation4], %s1281_s14 }
 0x3c7   : > { %p1975_p2 = pnand %p2934_p3, %p2933_p1 }
 0x3c9   : > { %2293 = dma.done.wait (!%p1975_p2), %s1282_s29, 4096  }
 0x3ca   : > { %2295 = vsyncadd (!%p1975_p2), %s1282_s29, 4294963200  ;;  %p23_p8 = scmp.ge.s32.totalorder %s2549_s11, 4   ;;  %s2935_s24 = smov %s2302_s25 }
 0x3cb   : > { %s2936_s25 = smov %s2306_s26  ;;  %s2937_s26 = smov %s2560_s17 }
 0x3cc   : > { %s2938_s27 = smov %s2549_s11  ;;  %25 = sbr.rel (!%p23_p8) target bundleno = 8 (0x8), region = 117 }
 0x3d3   :  { %1287 = vsyncpa [#allocation3], 1 }
 0x3d4   :  { %1289 = vsyncpa [#allocation3 + $0x1], 1 }
 0x3d5   :  { %1290 = vsyncpa [#allocation6], 1 }
 0x3d6   :  { %1291 = vsyncpa [#allocation9], 1 }
 0x3d7   :  { %1292 = vsyncpa [#allocation12], 1 }
 0x3d8   :  { %1293 = vsyncpa [#allocation4], 1 }
 0x3d9   :  { %1295 = vsyncpa [#allocation4 + $0x1], 1 }

</bundles_post_ra>
